<compile_context>
chip_gen: v5e
topology: v5e:2x2
jax: 0.10.0
libtpu: 0.0.40
codegen_flags: <defaults>
</compile_context>

<pallas_src>
import functools

import jax
import jax.numpy as jnp
from jax.experimental import pallas as pl
from jax.experimental.pallas import tpu as pltpu


def _pixel_unshuffle_kernel(x_ref, o_ref, t_ref, *, k):
    # x_ref: (Cb, TH, W)       input tile (a group of flattened (n, c) channels)
    # o_ref: (Cb, k*k, th, w)  output tile
    # t_ref: (Cb, W, th)       VMEM scratch: one row-deinterleaved slab, transposed
    Cb, TH, W = x_ref.shape
    th = TH // k
    w = W // k

    if k == 1:  # trivial copy
        o_ref[:, 0, :, :] = x_ref[...]
        return

    for yy in range(k):
        # Row de-interleave: rows yy, yy+k, ...  (strided sublane load, no compute)
        rows = x_ref[:, pl.ds(yy, th, stride=k), :]            # (Cb, th, W)
        # Put the column axis on sublanes so the column de-interleave is also a
        # cheap strided sublane read (lane-strided loads are not a TPU primitive).
        t_ref[...] = jnp.swapaxes(rows, -1, -2)                # (Cb, W, th)
        for xx in range(k):
            piece_t = t_ref[:, pl.ds(xx, w, stride=k), :]      # (Cb, w, th)
            o_ref[:, yy * k + xx, :, :] = jnp.swapaxes(piece_t, -1, -2)


def _largest_divisor_at_most(n, cap):
    cap = int(max(1, min(n, cap)))
    for d in range(cap, 0, -1):
        if n % d == 0:
            return d
    return 1


def pixel_unshuffle(x, downscale_factor):
    k = int(downscale_factor)
    N, C, H, W = x.shape
    assert k >= 1 and H % k == 0 and W % k == 0, "spatial dims must be divisible by k"
    h, w = H // k, W // k
    NC = N * C
    itemsize = jnp.dtype(x.dtype).itemsize

    # ---- block-size selection: big tiles (amortize ~0.35us/step) but VMEM-safe ----
    budget = 1 << 20  # ~1 MiB of input per block (in+out double-buffered ~4-5 MiB total)

    # Tile H only when one channel slab exceeds the budget.  th is kept a multiple
    # of 8 (or the full h) so both the (TH, W) input block and the (th, w) output
    # block satisfy the (8, 128) tiling rule.
    if H * W * itemsize <= budget:
        th = h
    else:
        th_fit, th_min = None, None
        d = 8
        while d <= h:
            if h % d == 0:
                if th_min is None:
                    th_min = d
                if (d * k) * W * itemsize <= budget:
                    th_fit = d
            d += 8
        th = th_fit if th_fit is not None else (th_min if th_min is not None else h)
    TH = th * k

    per_channel = TH * W * itemsize
    Cb = _largest_divisor_at_most(NC, max(1, budget // per_channel))
    # Keep at least 2 grid steps on a parallel axis (v7x has 2 TensorCores).
    if (NC // Cb) * (h // th) < 2 and NC >= 2:
        Cb = _largest_divisor_at_most(NC, NC // 2)

    grid = (NC // Cb, h // th)

    x_flat = x.reshape(NC, H, W)
    out_view = pl.pallas_call(
        functools.partial(_pixel_unshuffle_kernel, k=k),
        out_shape=jax.ShapeDtypeStruct((NC, k * k, h, w), x.dtype),
        grid_spec=pltpu.PrefetchScalarGridSpec(
            num_scalar_prefetch=0,
            grid=grid,
            in_specs=[pl.BlockSpec((Cb, TH, W), lambda b, r: (b, r, 0))],
            out_specs=pl.BlockSpec((Cb, k * k, th, w), lambda b, r: (b, 0, r, 0)),
            scratch_shapes=[pltpu.VMEM((Cb, W, th), x.dtype)],
        ),
        compiler_params=pltpu.CompilerParams(
            dimension_semantics=("parallel", "parallel"),
            vmem_limit_bytes=32 * 1024 * 1024,
        ),
    )(x_flat)

    # Contiguous (free) reshapes: (NC, k*k, h, w) -> (N, C*k*k, h, w); channel
    # ordering c*k*k + y*k + x matches the PyTorch conv2d reference.
    return out_view.reshape(N, C * k * k, h, w)


class PixelUnShuffle:
    """Mirror of the PyTorch module (no parameters)."""

    def __init__(self, downscale_factor):
        self.downscale_factor = downscale_factor

    def __call__(self, x):
        return pixel_unshuffle(x, self.downscale_factor)


def _reference_pixel_unshuffle(x, k):
    # Pure-JAX reference matching F.conv2d one-hot-kernel semantics.
    N, C, H, W = x.shape
    h, w = H // k, W // k
    y = x.reshape(N, C, h, k, w, k)
    y = jnp.transpose(y, (0, 1, 3, 5, 2, 4))     # (N, C, ky, kx, h, w)
    return y.reshape(N, C * k * k, h, w)


if __name__ == "__main__":
    key = jax.random.PRNGKey(0)
    N, C, H, W = 2, 4, 16, 16
    k = 2
    x = jax.random.normal(key, (N, C, H, W), dtype=jnp.float32)

    mod = PixelUnShuffle(k)
    out = jax.block_until_ready(mod(x))

    ref = _reference_pixel_unshuffle(x, k)
    assert out.shape == (N, C * k * k, H // k, W // k), out.shape
    assert out.dtype == x.dtype
    assert bool(jnp.all(out == ref)), "mismatch vs reference"

    print("KERNEL_OK")
</pallas_src>

<mosaic_0001>
module attributes {stable_mosaic.version = 11 : i64} {
  func.func @_pixel_unshuffle_kernel(%arg0: i32, %arg1: i32, %arg2: memref<4x16x16xf32, #tpu.memory_space<vmem>>, %arg3: memref<4x4x8x8xf32, #tpu.memory_space<vmem>>, %arg4: memref<4x16x8xf32, #tpu.memory_space<vmem>>) attributes {dimension_semantics = [#tpu.dimension_semantics<parallel>, #tpu.dimension_semantics<parallel>], iteration_bounds = array<i64: 2, 1>, scalar_prefetch = 0 : i64, scratch_operands = 1 : i64, tpu.core_type = #tpu.core_type<tc>, window_params = [{transform_indices = @transform_0, window_bounds = array<i64: 4, 16, 16>}, {transform_indices = @transform_1, window_bounds = array<i64: 4, 4, 8, 8>}]} {
    %c0 = arith.constant 0 : index
    %c0_0 = arith.constant 0 : index
    %c0_1 = arith.constant 0 : index
    %0 = tpu.strided_load %arg2[%c0, %c0_0, %c0_1] {strides = array<i32: 1, 2, 1>} : memref<4x16x16xf32, #tpu.memory_space<vmem>>, vector<4x8x16xf32>
    %1 = tpu.transpose %0, [0, 2, 1] : vector<4x8x16xf32> -> vector<4x16x8xf32>
    %c0_2 = arith.constant 0 : index
    %c0_3 = arith.constant 0 : index
    %c0_4 = arith.constant 0 : index
    %2 = vector.load %arg4[%c0_2, %c0_3, %c0_4] : memref<4x16x8xf32, #tpu.memory_space<vmem>>, vector<4x16x8xf32>
    tpu.vector_store %arg4[%c0_2, %c0_3, %c0_4], %1 {strides = array<i32>} : memref<4x16x8xf32, #tpu.memory_space<vmem>>, vector<4x16x8xf32>,
    %c0_5 = arith.constant 0 : index
    %c0_6 = arith.constant 0 : index
    %c0_7 = arith.constant 0 : index
    %3 = tpu.strided_load %arg4[%c0_5, %c0_6, %c0_7] {strides = array<i32: 1, 2, 1>} : memref<4x16x8xf32, #tpu.memory_space<vmem>>, vector<4x8x8xf32>
    %4 = tpu.transpose %3, [0, 2, 1] : vector<4x8x8xf32> -> vector<4x8x8xf32>
    %c0_8 = arith.constant 0 : index
    %c0_9 = arith.constant 0 : index
    %c0_10 = arith.constant 0 : index
    %c0_11 = arith.constant 0 : index
    %5 = vector.load %arg3[%c0_8, %c0_9, %c0_10, %c0_11] : memref<4x4x8x8xf32, #tpu.memory_space<vmem>>, vector<4x1x8x8xf32>
    %6 = vector.shape_cast %5 : vector<4x1x8x8xf32> to vector<4x8x8xf32>
    %7 = vector.shape_cast %4 : vector<4x8x8xf32> to vector<4x1x8x8xf32>
    tpu.vector_store %arg3[%c0_8, %c0_9, %c0_10, %c0_11], %7 {strides = array<i32>} : memref<4x4x8x8xf32, #tpu.memory_space<vmem>>, vector<4x1x8x8xf32>,
    %c0_12 = arith.constant 0 : index
    %c1 = arith.constant 1 : index
    %c0_13 = arith.constant 0 : index
    %8 = tpu.strided_load %arg4[%c0_12, %c1, %c0_13] {strides = array<i32: 1, 2, 1>} : memref<4x16x8xf32, #tpu.memory_space<vmem>>, vector<4x8x8xf32>
    %9 = tpu.transpose %8, [0, 2, 1] : vector<4x8x8xf32> -> vector<4x8x8xf32>
    %c0_14 = arith.constant 0 : index
    %c1_15 = arith.constant 1 : index
    %c0_16 = arith.constant 0 : index
    %c0_17 = arith.constant 0 : index
    %10 = vector.load %arg3[%c0_14, %c1_15, %c0_16, %c0_17] : memref<4x4x8x8xf32, #tpu.memory_space<vmem>>, vector<4x1x8x8xf32>
    %11 = vector.shape_cast %10 : vector<4x1x8x8xf32> to vector<4x8x8xf32>
    %12 = vector.shape_cast %9 : vector<4x8x8xf32> to vector<4x1x8x8xf32>
    tpu.vector_store %arg3[%c0_14, %c1_15, %c0_16, %c0_17], %12 {strides = array<i32>} : memref<4x4x8x8xf32, #tpu.memory_space<vmem>>, vector<4x1x8x8xf32>,
    %c0_18 = arith.constant 0 : index
    %c1_19 = arith.constant 1 : index
    %c0_20 = arith.constant 0 : index
    %13 = tpu.strided_load %arg2[%c0_18, %c1_19, %c0_20] {strides = array<i32: 1, 2, 1>} : memref<4x16x16xf32, #tpu.memory_space<vmem>>, vector<4x8x16xf32>
    %14 = tpu.transpose %13, [0, 2, 1] : vector<4x8x16xf32> -> vector<4x16x8xf32>
    %c0_21 = arith.constant 0 : index
    %c0_22 = arith.constant 0 : index
    %c0_23 = arith.constant 0 : index
    %15 = vector.load %arg4[%c0_21, %c0_22, %c0_23] : memref<4x16x8xf32, #tpu.memory_space<vmem>>, vector<4x16x8xf32>
    tpu.vector_store %arg4[%c0_21, %c0_22, %c0_23], %14 {strides = array<i32>} : memref<4x16x8xf32, #tpu.memory_space<vmem>>, vector<4x16x8xf32>,
    %c0_24 = arith.constant 0 : index
    %c0_25 = arith.constant 0 : index
    %c0_26 = arith.constant 0 : index
    %16 = tpu.strided_load %arg4[%c0_24, %c0_25, %c0_26] {strides = array<i32: 1, 2, 1>} : memref<4x16x8xf32, #tpu.memory_space<vmem>>, vector<4x8x8xf32>
    %17 = tpu.transpose %16, [0, 2, 1] : vector<4x8x8xf32> -> vector<4x8x8xf32>
    %c0_27 = arith.constant 0 : index
    %c2 = arith.constant 2 : index
    %c0_28 = arith.constant 0 : index
    %c0_29 = arith.constant 0 : index
    %18 = vector.load %arg3[%c0_27, %c2, %c0_28, %c0_29] : memref<4x4x8x8xf32, #tpu.memory_space<vmem>>, vector<4x1x8x8xf32>
    %19 = vector.shape_cast %18 : vector<4x1x8x8xf32> to vector<4x8x8xf32>
    %20 = vector.shape_cast %17 : vector<4x8x8xf32> to vector<4x1x8x8xf32>
    tpu.vector_store %arg3[%c0_27, %c2, %c0_28, %c0_29], %20 {strides = array<i32>} : memref<4x4x8x8xf32, #tpu.memory_space<vmem>>, vector<4x1x8x8xf32>,
    %c0_30 = arith.constant 0 : index
    %c1_31 = arith.constant 1 : index
    %c0_32 = arith.constant 0 : index
    %21 = tpu.strided_load %arg4[%c0_30, %c1_31, %c0_32] {strides = array<i32: 1, 2, 1>} : memref<4x16x8xf32, #tpu.memory_space<vmem>>, vector<4x8x8xf32>
    %22 = tpu.transpose %21, [0, 2, 1] : vector<4x8x8xf32> -> vector<4x8x8xf32>
    %c0_33 = arith.constant 0 : index
    %c3 = arith.constant 3 : index
    %c0_34 = arith.constant 0 : index
    %c0_35 = arith.constant 0 : index
    %23 = vector.load %arg3[%c0_33, %c3, %c0_34, %c0_35] : memref<4x4x8x8xf32, #tpu.memory_space<vmem>>, vector<4x1x8x8xf32>
    %24 = vector.shape_cast %23 : vector<4x1x8x8xf32> to vector<4x8x8xf32>
    %25 = vector.shape_cast %22 : vector<4x8x8xf32> to vector<4x1x8x8xf32>
    tpu.vector_store %arg3[%c0_33, %c3, %c0_34, %c0_35], %25 {strides = array<i32>} : memref<4x4x8x8xf32, #tpu.memory_space<vmem>>, vector<4x1x8x8xf32>,
    return
  }
  func.func @transform_0(%arg0: i32, %arg1: i32) -> (i32, i32, i32) {
    %c0_i32 = arith.constant 0 : i32
    %c0_i32_0 = arith.constant 0 : i32
    return %arg0, %arg1, %c0_i32 : i32, i32, i32
  }
  func.func @transform_1(%arg0: i32, %arg1: i32) -> (i32, i32, i32, i32) {
    %c0_i32 = arith.constant 0 : i32
    %c0_i32_0 = arith.constant 0 : i32
    %c0_i32_1 = arith.constant 0 : i32
    return %arg0, %c0_i32, %arg1, %c0_i32_0 : i32, i32, i32, i32
  }
}

</mosaic_0001>

<bundles_post_ra>
// kernel: tpu_custom_call.1
= control target key start
LH: loop header
LB: loop body
LE: loop exit
PB: predicated region body
PF: predicated region fallthrough
CT: control target
= control target key end

     0   :  { %6 = vsyncpa [#allocation4], 0  ;;  %s1512_s0 = inlined_call_operand.hbm [shape: f32[8,16,16], index: 0, kind: input, shape index: {}]   ;;  %s1513_s1 = inlined_call_operand.hbm [shape: f32[8,4,8,8], index: 1, kind: output, shape index: {}]  }
   0x1   :  { %8 = vsyncpa [#allocation4 + $0x1], 0 }
   0x2   :  { %9 = vsyncpa [#allocation5], 0 }
   0x3   :  { %11 = vsyncpa [#allocation5 + $0x1], 0  ;;  %s1340_s6 = smov 0   ;;  %s1342_s7 = smov 0  }
   0x4   :  { %s1344_s8 = smov 0   ;;  %s1346_s9 = smov 0  }
   0x5   :  { %s1348_s10 = smov 0   ;;  %s1350_s11 = smov 0  }
   0x6 LB: > { %s1105_s12 = sadd.s32 4294967295, %s1324_s11   ;;  %s1106_s13 = sadd.s32 4294967294, %s1324_s11   ;;  %s1324_s11 = sphi %s1350_s11, %s17_s11   ;;  %s1320_s10 = sphi %s1348_s10, %s1522_s10   ;;  %s1316_s9 = sphi %s1346_s9, %s1521_s9   ;;  %s1312_s8 = sphi %s1344_s8, %s1520_s8   ;;  %s1308_s7 = sphi %s1342_s7, %s1519_s7   ;;  %s1304_s6 = sphi %s1340_s6, %s1518_s6  }
   0x7   : > { %s29_s14 = sadd.s32 1, %s1320_s10  ;;  %s38_s15 = sadd.s32 1, %s1312_s8 }
   0x8   : > { %p31_p0 = scmp.ge.s32.totalorder %s29_s14, 2  ;;  %p45_p1 = scmp.ne.s32.totalorder %s1312_s8, %s1308_s7 }
   0x9   : > { %p46_p2 = scmp.eq.s32.totalorder %s1324_s11, 0  ;;  %p51_p3 = scmp.ne.s32.totalorder %s1308_s7, %s1304_s6 }
   0xa   : > { %s1524_s14 = smov (%p31_p0, %s29_s14), 0  ;;  %p52_p5 = scmp.eq.s32.totalorder %s1105_s12, 0 }
   0xb   : > { %p1381_p4 = por %p46_p2, %p45_p1  ;;  %s33_s17 = ssub.s32 %s1320_s10, %s1524_s14 }
   0xc   : > { %p77_p6 = scmp.eq.s32.totalorder %s1105_s12, 1  ;;  %p36_p7 = scmp.eq.s32.totalorder %s33_s17, 0 }
   0xd   : > { %p1387_p8 = por %p52_p5, %p51_p3  ;;  %p83_p10 = scmp.eq.s32.totalorder %s1106_s13, 1 }
   0xe   : > { %p1391_p9 = por %p77_p6, %p45_p1  ;;  %p1108_p12 = scmp.ge.s32.totalorder %s1324_s11, 2 }
   0xf   : > { %s1396_s20 = scalar_select %p36_p7, %s1312_s8, %s38_s15  }
  0x10   : > { %p1398_p11 = por %p83_p10, %p51_p3  ;;  %p1157_p13 = scmp.lt.s32.totalorder %s1324_s11, 2 }
  0x11   : > { %s103_s22 = sand.u32 1, %s1312_s8   ;;  %s1142_s24 = sshll.u32 %s1320_s10, 6 }
  0x12   : > { %s1109_s23 = sshll.u32 %s103_s22, 6  ;;  %s115_s27 = scalar_lea.hbm %s1512_s0, %s1142_s24 }
  0x13   : > { %s107_s28 = scalar_lea.vmem [#allocation3], %s1109_s23  ;;  %s116_s30 = sshll.u32 %s115_s27, 4  ;;  %s117_s30 = int_to_ptr.hbm [resolvable:$true] %s116_s30 }
  0x14   : > { %s118_s29 = sshll.u32 %s107_s28, 4  ;;  %p1150_p0 = pnand %p1157_p13, %p1381_p4  ;;  %s119_s29 = int_to_ptr.vmem [resolvable:$true] %s118_s29 }
  0x15   : > { %p1113_p1 = scmp.ge.s32.totalorder %s1324_s11, 1  ;;  %s104_s2 = scalar_lea.sflag [#allocation4], %s103_s22 }
  0x16   : > { %s1326_s3 = smov 128   ;;  %s1327_s4 = smov 8  }
  0x17   : > { %1152 = dma.hbm_to_vmem [thread:$0]  (!%p1150_p0), %s117_s30, 1024, %s119_s29, %s104_s2, %s1326_s3, %s1326_s3, %s1327_s4  }
  0x18   : > { %p126_p2 = scmp.lt.s32.totalorder %s1324_s11, 3 }
  0x1a   : > { %p127_p3 = pnand %p1113_p1, %p126_p2 }
  0x1b   : > { %s1414_s5 = sand.u32 (!%p127_p3), 1, %s1308_s7  }
  0x1c   : > { %130 = sbr.rel (%p127_p3) target bundleno = 439 (0x1b7), region = 24  ;;  %s1114_s12 = sshll.u32 (!%p127_p3), %s1414_s5, 6 }
  0x1d   : > { %s133_s13 = scalar_lea.sflag (!%p127_p3), [#allocation4], %s1414_s5  ;;  %s136_s15 = scalar_lea.vmem (!%p127_p3), [#allocation3], %s1114_s12 }
  0x21   : > { %1295 = dma.done.wait (%p1387_p8), %s133_s13, 1024  }
  0x22   : > { %1297 = vsyncadd (%p1387_p8), %s133_s13, 4294966272  ;;  %v1117_v0 = vld [vmem:[%s136_s15 + $0x20] ss:$2 sm:$0xff]  ;;  %v1124_v2 = vld [vmem:[%s136_s15 + $0x11] ss:$2 sm:$0xff]  ;;  %vm294_vm0 = vcmask 64512  }
  0x23   : > { %v159_v1 = vld [vmem:[%s136_s15] ss:$2 sm:$0xff]  ;;  %230 = vxpose.xlu1.b32.start.end [1/1] (short) (narrow) %v1117_v0, 16  ;;  %623 = vxpose.xlu2.b32.start.end [1/1] (short) (narrow) %v1124_v2, 16  ;;  %v1118_v3 = vld [vmem:[%s136_s15 + $0x30] ss:$2 sm:$0xff] }
  0x24   : > { %166 = vxpose.xlu0.b32.start.end [1/1] (short) (narrow) %v159_v1, 16  ;;  %v1116_v4 = vld [vmem:[%s136_s15 + $0x10] ss:$2 sm:$0xff]  ;;  %v1123_v5 = vld [vmem:[%s136_s15 + $0x1] ss:$2 sm:$0xff]  ;;  %s1115_s16 = sshll.u32 %s1414_s5, 7 }
  0x25   : > { %v1125_v6 = vld [vmem:[%s136_s15 + $0x21] ss:$2 sm:$0xff]  ;;  %v1126_v7 = vld [vmem:[%s136_s15 + $0x31] ss:$2 sm:$0xff]  ;;  %s1439_s17 = scalar_lea.vmem [#allocation6], %s1115_s16  ;;  %s1144_s18 = sshll.u32 %s1316_s9, 7 }
  0x26   : > { %s1015_s24 = scalar_lea.hbm %s1513_s1, %s1144_s18  ;;  %s1016_s25 = sshll.u32 %s1439_s17, 4  ;;  %s1017_s25 = int_to_ptr.vmem [resolvable:$true] %s1016_s25 }
  0x27   : > { %s1018_s26 = sshll.u32 %s1015_s24, 4  ;;  %s1002_s9 = scalar_lea.sflag [#allocation5], %s1414_s5  ;;  %s1019_s26 = int_to_ptr.hbm [resolvable:$true] %s1018_s26 }
  0x28   : > { %s1256_s27 = sshra.s32 %s1019_s26, 4  ;;  %s1262_s2 = scalar_lea.hbm %s1513_s1, 256  ;;  %s1257_s27 = int_to_ptr.hbm [resolvable:$true] %s1256_s27 }
  0x29   : > { %s1258_s28 = scalar_lea.hbm %s1257_s27, 128  ;;  %p1263_p7 = scmp.lt.s32.totalorder %s1257_s27, %s1513_s1 }
  0x2a   : > { %p1259_p4 = scmp.ne.s32.totalorder %s1257_s27, %s1258_s28  ;;  %p1264_p8 = scmp.lt.s32.totalorder %s1262_s2, %s1258_s28 }
  0x2c   : > { %p1260_p5 = pnand %p1259_p4, %p1391_p9  ;;  %p1265_p10 = por %p1264_p8, %p1263_p7 }
  0x2e   : > { %p1261_p6 = pneg %p1260_p5 }
  0x30   : > { %p1266_p13 = pnand %p1265_p10, %p1261_p6 }
  0x33   : > { %262 = vxpose.xlu1.b32.start.end [1/1] (short) (narrow) %v1118_v3, 16 }
  0x34   : > { %198 = vxpose.xlu0.b32.start.end [1/1] (short) (narrow) %v1116_v4, 16 }
  0x43   : > { %591 = vxpose.xlu1.b32.start.end [1/1] (short) (narrow) %v1123_v5, 16 }
  0x44   : > { %655 = vxpose.xlu0.b32.start.end [1/1] (short) (narrow) %v1125_v6, 16 }
  0x53   : > { %687 = vxpose.xlu1.b32.start.end [1/1] (short) (narrow) %v1126_v7, 16 }
  0xbc   : > { %v639_v16 = vpop.trf.xlu2 }
  0xc4   : > { %v640_v24 = vpop.trf.xlu2 }
  0xc7   : > { %v246_v8 = vpop.trf.xlu1 }
  0xc8   : > { %v182_v9 = vpop.trf.xlu0  ;;  %299 = vst.msk [vmem:[#allocation2 + $0x20] sm:$0xff] %vm294_vm0, %v246_v8 }
  0xc9   : > { %295 = vst.msk [vmem:[#allocation2] sm:$0xff] %vm294_vm0, %v182_v9 }
  0xcf   : > { %v247_v10 = vpop.trf.xlu1 }
  0xd0   : > { %v183_v11 = vpop.trf.xlu0  ;;  %300 = vst.msk [vmem:[#allocation2 + $0x28] sm:$0xff] %vm294_vm0, %v247_v10 }
  0xd1   : > { %296 = vst.msk [vmem:[#allocation2 + $0x8] sm:$0xff] %vm294_vm0, %v183_v11 }
  0xd7   : > { %v278_v12 = vpop.trf.xlu1  ;;  %v307_v22 = vld [vmem:[#allocation2 + $0x20] ss:$2 sm:$0xff]  ;;  %v447_v25 = vld [vmem:[#allocation2 + $0x21] ss:$2 sm:$0xff] }
  0xd8   : > { %v214_v13 = vpop.trf.xlu0  ;;  %301 = vst.msk [vmem:[#allocation2 + $0x30] sm:$0xff] %vm294_vm0, %v278_v12  ;;  %v443_v14 = vld [vmem:[#allocation2 + $0x1] ss:$2 sm:$0xff]  ;;  %v303_v15 = vld [vmem:[#allocation2] ss:$2 sm:$0xff] }
  0xd9   : > { %297 = vst.msk [vmem:[#allocation2 + $0x10] sm:$0xff] %vm294_vm0, %v214_v13  ;;  %450 = vxpose.xlu1.b32.start.end [1/1] (short) (narrow) %v443_v14, 8  ;;  %310 = vxpose.xlu2.b32.start.end [1/1] (short) (narrow) %v303_v15, 8 }
  0xdf   : > { %v279_v17 = vpop.trf.xlu1 }
  0xe0   : > { %v215_v18 = vpop.trf.xlu0  ;;  %302 = vst.msk [vmem:[#allocation2 + $0x38] sm:$0xff] %vm294_vm0, %v279_v17 }
  0xe1   : > { %298 = vst.msk [vmem:[#allocation2 + $0x18] sm:$0xff] %vm294_vm0, %v215_v18 }
  0xe7   : > { %v607_v19 = vpop.trf.xlu1  ;;  %v309_v20 = vld [vmem:[#allocation2 + $0x30] ss:$2 sm:$0xff]  ;;  %v449_v28 = vld [vmem:[#allocation2 + $0x31] ss:$2 sm:$0xff] }
  0xe8   : > { %v671_v21 = vpop.trf.xlu0  ;;  %719 = vst.msk [vmem:[#allocation2] sm:$0xff] %vm294_vm0, %v607_v19  ;;  %406 = vxpose.xlu0.b32.start.end [1/1] (short) (narrow) %v309_v20, 8  ;;  %v305_v23 = vld [vmem:[#allocation2 + $0x10] ss:$2 sm:$0xff]  ;;  %v445_v26 = vld [vmem:[#allocation2 + $0x11] ss:$2 sm:$0xff] }
  0xe9   : > { %342 = vxpose.xlu2.b32.start.end [1/1] (short) (narrow) %v305_v23, 8  ;;  %723 = vst.msk [vmem:[#allocation2 + $0x20] sm:$0xff] %vm294_vm0, %v671_v21 }
  0xea   : > { %721 = vst.msk [vmem:[#allocation2 + $0x10] sm:$0xff] %vm294_vm0, %v639_v16 }
  0xeb   : > { %722 = vst.msk [vmem:[#allocation2 + $0x18] sm:$0xff] %vm294_vm0, %v640_v24 }
  0xef   : > { %v608_v27 = vpop.trf.xlu1 }
  0xf0   : > { %v672_v29 = vpop.trf.xlu0  ;;  %720 = vst.msk [vmem:[#allocation2 + $0x8] sm:$0xff] %vm294_vm0, %v608_v27  ;;  %546 = vxpose.xlu0.b32.start.end [1/1] (short) (narrow) %v449_v28, 8 }
  0xf1   : > { %374 = vxpose.xlu2.b32.start.end [1/1] (short) (narrow) %v307_v22, 8  ;;  %724 = vst.msk [vmem:[#allocation2 + $0x28] sm:$0xff] %vm294_vm0, %v672_v29 }
  0xf2   : > { %v728_v31 = vld [vmem:[#allocation2 + $0x10] ss:$2 sm:$0xff]  ;;  %v865_v39 = vld [vmem:[#allocation2 + $0x11] ss:$2 sm:$0xff] }
  0xf7   : > { %v703_v30 = vpop.trf.xlu1  ;;  %v864_v34 = vld [vmem:[#allocation2 + $0x1] ss:$2 sm:$0xff]  ;;  %v727_v37 = vld [vmem:[#allocation2] ss:$2 sm:$0xff] }
  0xf8   : > { %725 = vst.msk [vmem:[#allocation2 + $0x30] sm:$0xff] %vm294_vm0, %v703_v30  ;;  %763 = vxpose.xlu0.b32.start.end [1/1] (short) (narrow) %v728_v31, 8  ;;  %v729_v32 = vld [vmem:[#allocation2 + $0x20] ss:$2 sm:$0xff]  ;;  %v866_v35 = vld [vmem:[#allocation2 + $0x21] ss:$2 sm:$0xff] }
  0xf9   : > { %482 = vxpose.xlu2.b32.start.end [1/1] (short) (narrow) %v445_v26, 8  ;;  %795 = vxpose.xlu1.b32.start.end [1/1] (short) (narrow) %v729_v32, 8 }
  0xff   : > { %v704_v33 = vpop.trf.xlu1 }
 0x100   : > { %726 = vst.msk [vmem:[#allocation2 + $0x38] sm:$0xff] %vm294_vm0, %v704_v33  ;;  %868 = vxpose.xlu0.b32.start.end [1/1] (short) (narrow) %v864_v34, 8 }
 0x101   : > { %514 = vxpose.xlu2.b32.start.end [1/1] (short) (narrow) %v447_v25, 8 }
 0x107   : > { %v867_v36 = vld [vmem:[#allocation2 + $0x31] ss:$2 sm:$0xff]  ;;  %v730_v38 = vld [vmem:[#allocation2 + $0x30] ss:$2 sm:$0xff] }
 0x108   : > { %932 = vxpose.xlu0.b32.start.end [1/1] (short) (narrow) %v866_v35, 8  ;;  %964 = vxpose.xlu1.b32.start.end [1/1] (short) (narrow) %v867_v36, 8 }
 0x109   : > { %731 = vxpose.xlu2.b32.start.end [1/1] (short) (narrow) %v727_v37, 8 }
 0x111   : > { %827 = vxpose.xlu2.b32.start.end [1/1] (short) (narrow) %v730_v38, 8 }
 0x119   : > { %900 = vxpose.xlu2.b32.start.end [1/1] (short) (narrow) %v865_v39, 8 }
 0x172   : > { %v326_v40 = vpop.trf.xlu2 }
 0x173   : > { %438 = vst.msk [vmem:[%s1439_s17] sm:$0xff] %vm294_vm0, %v326_v40 }
 0x17d   : > { %v466_v41 = vpop.trf.xlu1 }
 0x17e   : > { %1119 = vst.msk [vmem:[%s1439_s17 + $0x8] sm:$0xff] %vm294_vm0, %v466_v41 }
 0x182   : > { %v358_v42 = vpop.trf.xlu2 }
 0x183   : > { %439 = vst.msk [vmem:[%s1439_s17 + $0x20] sm:$0xff] %vm294_vm0, %v358_v42 }
 0x18a   : > { %v390_v43 = vpop.trf.xlu2 }
 0x18b   : > { %440 = vst.msk [vmem:[%s1439_s17 + $0x40] sm:$0xff] %vm294_vm0, %v390_v43 }
 0x18c   : > { %v422_v44 = vpop.trf.xlu0 }
 0x18d   : > { %441 = vst.msk [vmem:[%s1439_s17 + $0x60] sm:$0xff] %vm294_vm0, %v422_v44 }
 0x192   : > { %v498_v45 = vpop.trf.xlu2 }
 0x193   : > { %1120 = vst.msk [vmem:[%s1439_s17 + $0x28] sm:$0xff] %vm294_vm0, %v498_v45 }
 0x194   : > { %v562_v46 = vpop.trf.xlu0 }
 0x195   : > { %1122 = vst.msk [vmem:[%s1439_s17 + $0x68] sm:$0xff] %vm294_vm0, %v562_v46 }
 0x19a   : > { %v530_v47 = vpop.trf.xlu2 }
 0x19b   : > { %1121 = vst.msk [vmem:[%s1439_s17 + $0x48] sm:$0xff] %vm294_vm0, %v530_v47 }
 0x19c   : > { %v779_v48 = vpop.trf.xlu0 }
 0x19d   : > { %1128 = vst.msk [vmem:[%s1439_s17 + $0x30] sm:$0xff] %vm294_vm0, %v779_v48  ;;  %v811_v49 = vpop.trf.xlu1 }
 0x19e   : > { %1129 = vst.msk [vmem:[%s1439_s17 + $0x50] sm:$0xff] %vm294_vm0, %v811_v49 }
 0x1a2   : > { %v747_v50 = vpop.trf.xlu2 }
 0x1a3   : > { %1127 = vst.msk [vmem:[%s1439_s17 + $0x10] sm:$0xff] %vm294_vm0, %v747_v50 }
 0x1a4   : > { %v884_v51 = vpop.trf.xlu0 }
 0x1a5   : > { %1131 = vst.msk [vmem:[%s1439_s17 + $0x18] sm:$0xff] %vm294_vm0, %v884_v51 }
 0x1aa   : > { %v843_v52 = vpop.trf.xlu2 }
 0x1ab   : > { %1130 = vst.msk [vmem:[%s1439_s17 + $0x70] sm:$0xff] %vm294_vm0, %v843_v52 }
 0x1ac   : > { %v980_v53 = vpop.trf.xlu1  ;;  %v948_v54 = vpop.trf.xlu0 }
 0x1ad   : > { %1134 = vst.msk [vmem:[%s1439_s17 + $0x78] sm:$0xff] %vm294_vm0, %v980_v53 }
 0x1ae   : > { %1133 = vst.msk [vmem:[%s1439_s17 + $0x58] sm:$0xff] %vm294_vm0, %v948_v54 }
 0x1b2   : > { %v916_v55 = vpop.trf.xlu2 }
 0x1b3   : > { %1132 = vst.msk [vmem:[%s1439_s17 + $0x38] sm:$0xff] %vm294_vm0, %v916_v55 }
 0x1b4   : > { %1269 = shalt.err (!%p1266_p13)
}
 0x1b5   : > { %s1328_s5 = smov 128   ;;  %s1329_s12 = smov 8  }
 0x1b6   : > { %1147 = dma.vmem_to_hbm [thread:$0]  (%p1391_p9), %s1017_s25, 2048, %s1019_s26, %s1002_s9, %s1328_s5, %s1328_s5, %s1329_s12  }
 0x1b7 PF: > { %s1033_s13 = sand.u32 1, %s1304_s6   ;;  %p1154_p0 = pnand %p1108_p12, %p1398_p11 }
 0x1b8   : > { %s1034_s15 = scalar_lea.sflag [#allocation5], %s1033_s13 }
 0x1b9   : > { %p1155_p1 = pneg %p1154_p0 }
 0x1bb   : > { %1299 = dma.done.wait (%p1155_p1), %s1034_s15, 2048  }
 0x1bc   : > { %1301 = vsyncadd (%p1155_p1), %s1034_s15, 4294965248  ;;  %s17_s11 = sadd.s32 1, %s1324_s11   ;;  %s1518_s6 = smov %s1308_s7 }
 0x1bd   : > { %p14_p2 = scmp.ge.s32.totalorder %s17_s11, 4   ;;  %s1519_s7 = smov %s1312_s8 }
 0x1be   : > { %s1520_s8 = smov %s1396_s20  ;;  %s1521_s9 = smov %s1320_s10 }
 0x1bf   : > { %s1522_s10 = smov %s1524_s14  ;;  %16 = sbr.rel (!%p14_p2) target bundleno = 6 (0x6), region = 86 }
 0x1c4   :  { %1040 = vsyncpa [#allocation4], 1 }
 0x1c5   :  { %1042 = vsyncpa [#allocation4 + $0x1], 1 }
 0x1c6   :  { %1043 = vsyncpa [#allocation5], 1 }
 0x1c7   :  { %1045 = vsyncpa [#allocation5 + $0x1], 1 }

</bundles_post_ra>
